<compile_context>
chip_gen: v6e
topology: v6e:2x2x1
jax: 0.10.0
libtpu: 0.0.40
codegen_flags: <defaults>
</compile_context>

<pallas_src>
import math
from functools import partial

import jax
import jax.numpy as jnp
from jax import lax
from jax.experimental import pallas as pl
from jax.experimental.pallas import tpu as pltpu


def _round_up(a, m):
    return ((a + m - 1) // m) * m


def _tokenizer_kernel(n_features, vocab_size, idx_ref, rhs_ref, bias_ref, out_ref):
    # idx_ref : VMEM (TB, F)       int32 — offset-shifted vocabulary indices (batch tile)
    # rhs_ref : VMEM (V, FD_pad)   f32   — scattered table: feature f's rows live in
    #                                      lanes f*D:(f+1)*D, zeros elsewhere
    # bias_ref: VMEM (1, FD_pad)   f32   — per-feature bias, flattened lane-dense
    # out_ref : VMEM (TB, FD_pad)  f32   — lane-dense output tile
    idx = idx_ref[...]                                            # (TB, F)

    # (1, V) iota; the compare broadcasts over the batch tile (no (TB, V) iota in vregs).
    vocab_ids = lax.broadcasted_iota(jnp.int32, (1, vocab_size), 1)

    # Multi-hot mask: per-feature hit columns are disjoint (offsets partition [0, V)),
    # so a logical-or accumulation is exact.  Small static loop, single live accumulator.
    hit = idx[:, 0:1] == vocab_ids                                # (TB, V)
    for f in range(1, n_features):
        hit = jnp.logical_or(hit, idx[:, f:f + 1] == vocab_ids)
    multihot = hit.astype(jnp.float32)                            # (TB, V)

    # Single fused MXU matmul -> lane-dense tokens.  HIGHEST precision keeps the f32
    # embedding operand exact (the "gather" must not pass through truncated bf16).
    tok = jnp.dot(multihot, rhs_ref[...],
                  preferred_element_type=jnp.float32,
                  precision=lax.Precision.HIGHEST)                # (TB, FD_pad)

    out_ref[...] = (tok + bias_ref[...]).astype(out_ref.dtype)


def categorical_feature_tokenizer(x, category_offsets, embeddings, bias=None):
    """x: (B, F) ints; embeddings: (V, D); bias: (F, D) or None. Returns (B, F, D)."""
    B, F = x.shape
    V, D = embeddings.shape
    FD = F * D
    FD_pad = _round_up(FD, 128)        # unmasked full-width stores on every generation
    V_pad = _round_up(V, 128)

    # ---- wrapper-side precompute (cheap XLA ops, done once) -------------------------
    offsets = category_offsets.astype(jnp.int32)
    idx = x.astype(jnp.int32) + offsets[None]                     # (B, F)
    # NOTE: out-of-range / negative inputs produce an all-zero multi-hot row for that
    # feature (output = bias only) instead of an OOB read — documented semantic delta.

    # Scattered RHS (V, F*D): row v carries embeddings[v] in its feature's lane slot.
    row_ids = jnp.arange(V, dtype=jnp.int32)
    feat_of_row = jnp.sum(row_ids[:, None] >= offsets[None, :], axis=1) - 1     # (V,)
    feat_onehot = (feat_of_row[:, None] ==
                   jnp.arange(F, dtype=jnp.int32)[None, :]).astype(embeddings.dtype)
    scattered_rhs = (feat_onehot[:, :, None] * embeddings[:, None, :]).reshape(V, FD)

    if bias is None:
        bias_flat = jnp.zeros((1, FD), embeddings.dtype)
    else:
        bias_flat = bias.reshape(1, FD).astype(embeddings.dtype)

    if FD_pad != FD:
        scattered_rhs = jnp.pad(scattered_rhs, ((0, 0), (0, FD_pad - FD)))
        bias_flat = jnp.pad(bias_flat, ((0, 0), (0, FD_pad - FD)))

    # ---- batch-tile selection against an explicit VMEM budget -----------------------
    def vmem_bytes(tb):
        return (2 * tb * F * 4            # idx block, double-buffered
                + 2 * tb * FD_pad * 4     # out block, double-buffered
                + 2 * V * FD_pad * 4      # scattered table (grid-invariant, counted x2)
                + 2 * FD_pad * 4          # bias
                + 2 * tb * V_pad * 4)     # multi-hot temporaries / headroom

    VMEM_BUDGET = 40 * 1024 * 1024        # conservative across v5e / v6e / v7x

    tb = min(512, _round_up(B, 8))
    # v7x has 2 TensorCores: keep >= 2 grid steps on the parallel batch axis for
    # medium/large batches so both cores get work.  No effect on v5e/v6e (1 TC).
    if B >= 256:
        tb = min(tb, _round_up(pl.cdiv(B, 2), 8))
    while tb > 8 and vmem_bytes(tb) > VMEM_BUDGET:
        tb = max(8, _round_up(tb // 2, 8))

    B_pad = _round_up(B, tb)
    if B_pad != B:
        idx = jnp.pad(idx, ((0, B_pad - B), (0, 0)))   # padded rows -> valid index 0

    grid = B_pad // tb

    cost = pl.CostEstimate(
        flops=2 * B_pad * V * FD_pad + B_pad * FD_pad,            # fused matmul + bias
        transcendentals=0,
        bytes_accessed=(B_pad * F * 4) + (V * FD_pad * 4)
                        + (FD_pad * 4) + (B_pad * FD_pad * 4),
    )

    vmem_limit = int(min(max(vmem_bytes(tb) + (4 << 20), 16 << 20), 48 << 20))

    out_flat = pl.pallas_call(
        partial(_tokenizer_kernel, F, V),
        out_shape=jax.ShapeDtypeStruct((B_pad, FD_pad), embeddings.dtype),
        grid_spec=pltpu.PrefetchScalarGridSpec(
            num_scalar_prefetch=0,
            grid=(grid,),
            in_specs=[
                pl.BlockSpec((tb, F), lambda i: (i, 0)),          # batch-tiled indices
                pl.BlockSpec((V, FD_pad), lambda i: (0, 0)),      # scattered table (invariant)
                pl.BlockSpec((1, FD_pad), lambda i: (0, 0)),      # flattened bias
            ],
            out_specs=pl.BlockSpec((tb, FD_pad), lambda i: (i, 0)),
        ),
        compiler_params=pltpu.CompilerParams(
            dimension_semantics=("parallel",),
            vmem_limit_bytes=vmem_limit),
        cost_estimate=cost,
    )(idx, scattered_rhs, bias_flat)

    return out_flat[:B, :FD].reshape(B, F, D)


if __name__ == "__main__":
    # Module configuration (deterministic, in-script "init")
    cardinalities = [3, 5, 7, 4]     # F = 4 features
    d_token = 32                     # F * d_token = 128 (already lane-dense)
    B = 8
    F = len(cardinalities)
    V = sum(cardinalities)

    key = jax.random.PRNGKey(0)
    k_emb, k_bias, k_x = jax.random.split(key, 3)

    d_sqrt_inv = 1.0 / math.sqrt(d_token)
    # _TokenInitialization.UNIFORM: U(-1/sqrt(d), 1/sqrt(d))
    embeddings = jax.random.uniform(
        k_emb, (V, d_token), jnp.float32, minval=-d_sqrt_inv, maxval=d_sqrt_inv)
    bias = jax.random.uniform(
        k_bias, (F, d_token), jnp.float32, minval=-d_sqrt_inv, maxval=d_sqrt_inv)

    # category_offsets = cumsum([0] + cardinalities[:-1])
    category_offsets = jnp.cumsum(
        jnp.array([0] + cardinalities[:-1], dtype=jnp.int32))

    # Random valid categorical inputs: x[:, f] in [0, cardinalities[f])
    cols = []
    for f, card in enumerate(cardinalities):
        kf = jax.random.fold_in(k_x, f)
        cols.append(jax.random.randint(kf, (B,), 0, card, dtype=jnp.int32))
    x = jnp.stack(cols, axis=1)  # (B, F) int32

    out = categorical_feature_tokenizer(x, category_offsets, embeddings, bias)
    out = jax.block_until_ready(out)

    # Pure-JAX reference check
    ref = embeddings[x + category_offsets[None]] + bias[None]
    assert out.shape == (B, F, d_token)
    assert jnp.allclose(out, ref, atol=1e-6), "mismatch vs reference"

    print("KERNEL_OK")
</pallas_src>

<mosaic_0001>
module attributes {stable_mosaic.version = 11 : i64} {
  func.func @_tokenizer_kernel(%arg0: i32, %arg1: memref<8x4xi32, #tpu.memory_space<vmem>>, %arg2: memref<19x128xf32, #tpu.memory_space<vmem>>, %arg3: memref<1x128xf32, #tpu.memory_space<vmem>>, %arg4: memref<8x128xf32, #tpu.memory_space<vmem>>) attributes {dimension_semantics = [#tpu.dimension_semantics<parallel>], iteration_bounds = array<i64: 1>, scalar_prefetch = 0 : i64, scratch_operands = 0 : i64, tpu.core_type = #tpu.core_type<tc>, window_params = [{transform_indices = @transform_0, window_bounds = array<i64: 8, 4>}, {pipeline_mode = #tpu.pipeline_mode<synchronous>, transform_indices = @transform_1, window_bounds = array<i64: 19, 128>}, {pipeline_mode = #tpu.pipeline_mode<synchronous>, transform_indices = @transform_2, window_bounds = array<i64: 1, 128>}, {transform_indices = @transform_3, window_bounds = array<i64: 8, 128>}]} {
    %c0 = arith.constant 0 : index
    %c0_0 = arith.constant 0 : index
    %0 = vector.load %arg1[%c0, %c0_0] : memref<8x4xi32, #tpu.memory_space<vmem>>, vector<8x4xi32>
    %1 = tpu.iota {dimensions = array<i32: 1>} : vector<1x19xi32>
    %2 = vector.extract_strided_slice %0 {offsets = [0, 0], sizes = [8, 1], strides = [1, 1]} : vector<8x4xi32> to vector<8x1xi32>
    %3 = vector.broadcast %2 : vector<8x1xi32> to vector<8x19xi32>
    %4 = vector.broadcast %1 : vector<1x19xi32> to vector<8x19xi32>
    %5 = arith.cmpi eq, %3, %4 : vector<8x19xi32>
    %6 = vector.extract_strided_slice %0 {offsets = [0, 1], sizes = [8, 1], strides = [1, 1]} : vector<8x4xi32> to vector<8x1xi32>
    %7 = vector.broadcast %6 : vector<8x1xi32> to vector<8x19xi32>
    %8 = vector.broadcast %1 : vector<1x19xi32> to vector<8x19xi32>
    %9 = arith.cmpi eq, %7, %8 : vector<8x19xi32>
    %10 = arith.ori %5, %9 : vector<8x19xi1>
    %11 = vector.extract_strided_slice %0 {offsets = [0, 2], sizes = [8, 1], strides = [1, 1]} : vector<8x4xi32> to vector<8x1xi32>
    %12 = vector.broadcast %11 : vector<8x1xi32> to vector<8x19xi32>
    %13 = vector.broadcast %1 : vector<1x19xi32> to vector<8x19xi32>
    %14 = arith.cmpi eq, %12, %13 : vector<8x19xi32>
    %15 = arith.ori %10, %14 : vector<8x19xi1>
    %16 = vector.extract_strided_slice %0 {offsets = [0, 3], sizes = [8, 1], strides = [1, 1]} : vector<8x4xi32> to vector<8x1xi32>
    %17 = vector.broadcast %16 : vector<8x1xi32> to vector<8x19xi32>
    %18 = vector.broadcast %1 : vector<1x19xi32> to vector<8x19xi32>
    %19 = arith.cmpi eq, %17, %18 : vector<8x19xi32>
    %20 = arith.ori %15, %19 : vector<8x19xi1>
    %21 = arith.extui %20 : vector<8x19xi1> to vector<8x19xi32>
    %22 = arith.sitofp %21 : vector<8x19xi32> to vector<8x19xf32>
    %c0_1 = arith.constant 0 : index
    %c0_2 = arith.constant 0 : index
    %23 = vector.load %arg2[%c0_1, %c0_2] : memref<19x128xf32, #tpu.memory_space<vmem>>, vector<19x128xf32>
    %cst = arith.constant dense<0.000000e+00> : vector<8x128xf32>
    %24 = tpu.matmul %22, %23, %cst {dimension_numbers = #tpu.dot_dimension_numbers<[1], [0], [0], [1], [0, 0, 1, 1], [], []>, precision = #tpu.contract_precision<fp32>} : vector<8x19xf32>, vector<19x128xf32>, vector<8x128xf32> -> vector<8x128xf32>
    %c0_3 = arith.constant 0 : index
    %c0_4 = arith.constant 0 : index
    %25 = vector.load %arg3[%c0_3, %c0_4] : memref<1x128xf32, #tpu.memory_space<vmem>>, vector<1x128xf32>
    %26 = vector.broadcast %25 : vector<1x128xf32> to vector<8x128xf32>
    %27 = arith.addf %24, %26 : vector<8x128xf32>
    %c0_5 = arith.constant 0 : index
    %c0_6 = arith.constant 0 : index
    %28 = vector.load %arg4[%c0_5, %c0_6] : memref<8x128xf32, #tpu.memory_space<vmem>>, vector<8x128xf32>
    tpu.vector_store %arg4[%c0_5, %c0_6], %27 {strides = array<i32>} : memref<8x128xf32, #tpu.memory_space<vmem>>, vector<8x128xf32>,
    return
  }
  func.func @transform_0(%arg0: i32) -> (i32, i32) {
    %c0_i32 = arith.constant 0 : i32
    %c0_i32_0 = arith.constant 0 : i32
    return %arg0, %c0_i32 : i32, i32
  }
  func.func @transform_1(%arg0: i32) -> (i32, i32) {
    %c0_i32 = arith.constant 0 : i32
    %c0_i32_0 = arith.constant 0 : i32
    %c0_i32_1 = arith.constant 0 : i32
    return %c0_i32, %c0_i32_0 : i32, i32
  }
  func.func @transform_2(%arg0: i32) -> (i32, i32) {
    %c0_i32 = arith.constant 0 : i32
    %c0_i32_0 = arith.constant 0 : i32
    %c0_i32_1 = arith.constant 0 : i32
    return %c0_i32, %c0_i32_0 : i32, i32
  }
  func.func @transform_3(%arg0: i32) -> (i32, i32) {
    %c0_i32 = arith.constant 0 : i32
    %c0_i32_0 = arith.constant 0 : i32
    return %arg0, %c0_i32 : i32, i32
  }
}

</mosaic_0001>

<bundles_post_ra>
// kernel: tpu_custom_call.1
= control target key start
LH: loop header
LB: loop body
LE: loop exit
PB: predicated region body
PF: predicated region fallthrough
CT: control target
= control target key end

     0   :  { %8 = vsyncpa [#allocation3], 0  ;;  %s823_s0 = inlined_call_operand.vmem [shape: s32[8,4], index: 0, kind: input, shape index: {}]   ;;  %s824_s1 = inlined_call_operand.hbm [shape: f32[19,128], index: 1, kind: input, shape index: {}]   ;;  %s825_s2 = inlined_call_operand.vmem [shape: f32[1,128], index: 2, kind: input, shape index: {}]   ;;  %s826_s3 = inlined_call_operand.hbm [shape: f32[8,128], index: 3, kind: output, shape index: {}]  }
   0x1   :  { %9 = vsyncpa [#allocation4], 0  ;;  %s701_s12 = smov [#allocation2]  }
   0x2   :  { %s17_s13 = sshll.u32 %s701_s12, 4  ;;  %s18_s13 = int_to_ptr.vmem [resolvable:$true] %s17_s13 }
   0x3   :  { %s665_s14 = scalar_lea.vmem %s18_s13, 384  ;;  %p670_p1 = scmp.lt.s32.totalorder %s18_s13, %s18_s13 }
   0x4   :  { %p666_p0 = scmp.ne.s32.totalorder %s18_s13, %s665_s14  ;;  %p671_p2 = scmp.lt.s32.totalorder %s665_s14, %s665_s14 }
   0x6   :  { %p672_p3 = por %p671_p2, %p670_p1 }
   0x8   :  { %p673_p4 = pnand %p672_p3, %p666_p0 }
   0xa   :  { %676 = shalt.err (!%p673_p4)
}
   0xb   :  { %s702_s15 = smov 128   ;;  %s703_s16 = smov 8  }
   0xc   :  { %23 = dma.hbm_to_vmem [thread:$0]  %s824_s1, 384, %s18_s13, [#allocation3], %s702_s15, %s702_s15, %s703_s16  }
   0xd   :  { %697 = dma.done.wait [#allocation3], 384  }
   0xe   :  { %698 = vsyncadd [#allocation3], 4294966912  ;;  %v704_v0 = vmov 0   ;;  %v705_v1 = vmov 2   ;;  %v706_v2 = vmov 0.0   ;;  %vm67_vm0 = vcmask 1042432  }
   0xf   :  { %652 = vset.pattern.permute.xlu0 %v704_v0  ;;  %654 = vset.pattern.permute.xlu1 %v705_v1  ;;  %v29_v3 = vld [vmem:[%s823_s0] sm:$0xff]  ;;  %v55_v4 = vld [vmem:[#allocation2 + $0x10] sm:$0x7]  ;;  %v54_v5 = vld [vmem:[#allocation2 + $0x8] sm:$0xff]  ;;  %v707_v14 = vmov 1   ;;  %v708_v15 = vmov 3   ;;  %v30_v25 = vlaneseq }
  0x10   :  { %597 = vmatprep.subr.mxu1 %v706_v2  ;;  %588 = vmatprep.subr.mxu0 %v706_v2  ;;  %v69_v6 = vsel %vm67_vm0, %v55_v4, 0  ;;  %v739_v7 = vand.u32 4294901760, %v54_v5  ;;  %v53_v8 = vld [vmem:[#allocation2] sm:$0xff]  ;;  %vm709_vm1 = vmmov 0   ;;  %vm63_vm8 = vcmask 154624   ;;  %s710_s21 = smov [#allocation5]  }
  0x11   :  { %33 = vperm.xlu0 %652, %v29_v3   ;;  %42 = vperm.xlu1 %654, %v29_v3   ;;  %v741_v9 = vand.u32 4294901760, %v69_v6  ;;  %v743_v10 = vand.u32 4294901760, %v53_v8  ;;  %v31_v28 = vand.u32 127, %v30_v25  ;;  %v560_v40 = vld [vmem:[%s825_s2] ss:$0 sm:$0xff]  ;;  %s550_s22 = sshll.u32 %s710_s21, 4  ;;  %s551_s22 = int_to_ptr.vmem [resolvable:$true] %s550_s22 }
  0x12   :  { %v746_v11 = vsub.f32 %v54_v5, %v739_v7  ;;  %603 = vmatprep.mubr.msk.f32.mxu1 %vm709_vm1, %v706_v2  ;;  %594 = vmatprep.mubr.msk.f32.mxu0 %vm709_vm1, %v706_v2  ;;  %s677_s2 = scalar_lea.vmem %s551_s22, 128  ;;  %p682_p6 = scmp.lt.s32.totalorder %s551_s22, %s551_s22 }
  0x13   :  { %v749_v12 = vsub.f32 %v69_v6, %v741_v9  ;;  %v752_v13 = vsub.f32 %v53_v8, %v743_v10  ;;  %589 = vmatpush3.msra.mxu0 %v741_v9  ;;  %p678_p5 = scmp.ne.s32.totalorder %s551_s22, %s677_s2  ;;  %p683_p7 = scmp.lt.s32.totalorder %s677_s2, %s677_s2 }
  0x14   :  { %v185_v16 = vand.u32 4294901760, %v746_v11  ;;  %590 = vmatprep.subr.mxu0 %v706_v2 }
  0x15   :  { %653 = vset.pattern.permute.xlu0 %v707_v14  ;;  %655 = vset.pattern.permute.xlu1 %v708_v15  ;;  %v178_v17 = vand.u32 4294901760, %v749_v12  ;;  %v192_v18 = vand.u32 4294901760, %v752_v13  ;;  %p684_p8 = por %p683_p7, %p682_p6 }
  0x16   :  { %37 = vperm.xlu0 %653, %v29_v3   ;;  %47 = vperm.xlu1 %655, %v29_v3   ;;  %v186_v19 = vsub.f32 %v746_v11, %v185_v16 }
  0x17   :  { %v179_v20 = vsub.f32 %v749_v12, %v178_v17  ;;  %v193_v21 = vsub.f32 %v752_v13, %v192_v18  ;;  %591 = vmatpush3.msra.mxu0 %v739_v7  ;;  %p685_p9 = pnand %p684_p8, %p678_p5 }
  0x18   :  { %592 = vmatprep.subr.mxu0 %v706_v2  ;;  %v187_v23 = vand.u32 4294901760, %v186_v19 }
  0x19   :  { %v180_v22 = vand.u32 4294901760, %v179_v20  ;;  %593 = vmatpush3.msra.mxu0 %v743_v10  ;;  %v194_v24 = vand.u32 4294901760, %v193_v21 }
  0x1a   :  { %656 = vset.pattern.permute.xlu0 %v708_v15  ;;  %606 = vmatprep.subr.mxu0 %v706_v2 }
  0x1b   :  { %598 = vmatpush3.msra.mxu1 %v180_v22 }
  0x1c   :  { %599 = vmatprep.subr.mxu1 %v706_v2 }
  0x1d   :  { %600 = vmatpush3.msra.mxu1 %v187_v23 }
  0x1e   :  { %601 = vmatprep.subr.mxu1 %v706_v2 }
  0x1f   :  { %602 = vmatpush3.msra.mxu1 %v194_v24 }
  0x20   :  { %615 = vmatprep.subr.mxu1 %v706_v2 }
  0x8c   :  { %v34_v26 = vpop.permute.xlu0 %33  ;;  %v43_v27 = vpop.permute.xlu1 %42 }
  0x8d   :  { %vm35_vm2 = vcmp.eq.s32.totalorder %v34_v26, %v31_v28  ;;  %vm44_vm5 = vcmp.eq.s32.totalorder %v43_v27, %v31_v28 }
  0x91   :  { %v38_v29 = vpop.permute.xlu0 %37  ;;  %v48_v30 = vpop.permute.xlu1 %47 }
  0x92   :  { %vm39_vm3 = vcmp.eq.s32.totalorder %v38_v29, %v31_v28  ;;  %vm49_vm4 = vcmp.eq.s32.totalorder %v48_v30, %v31_v28 }
  0x93   :  { %vm40_vm6 = vmor %vm35_vm2, %vm39_vm3 }
  0x94   :  { %vm45_vm7 = vmor %vm40_vm6, %vm44_vm5 }
  0x95   :  { %vm50_vm9 = vmor %vm45_vm7, %vm49_vm4 }
  0x96   :  { %v559_v31 = vsel %vm50_vm9, 1.0, %v706_v2 }
  0x97   :  { %v65_v32 = vsel %vm63_vm8, %v559_v31, 0  ;;  %604 = vmatmul.mubr.msk.f32.vlgmr.msra.gmra.mxu1 %vm63_vm8, %v559_v31 }
  0x98   :  { %v140_v33 = vsub.f32 %v65_v32, %v65_v32  ;;  %616 = vmatpush3.msra.mxu1 %v741_v9  ;;  %621 = vmatprep.mubr.msk.f32.mxu1 %vm709_vm1, %v706_v2 }
  0x99   :  { %617 = vmatprep.subr.mxu1 %v706_v2 }
  0x9a   :  { %618 = vmatpush3.msra.mxu1 %v739_v7  ;;  %v141_v34 = vand.u32 4294901760, %v140_v33 }
  0x9b   :  { %619 = vmatprep.subr.mxu1 %v706_v2 }
  0x9c   :  { %620 = vmatpush3.msra.mxu1 %v743_v10  ;;  %v142_v35 = vsub.f32 %v140_v33, %v141_v34 }
  0x9d   :  { %622 = vmatmul.mubr.f32.vlgmr.msra.gmra.mxu1 %v141_v34  ;;  %633 = vmatprep.subr.mxu1 %v706_v2 }
  0x9e   :  { %634 = vmatpush3.msra.mxu1 %v741_v9  ;;  %v143_v36 = vand.u32 4294901760, %v142_v35  ;;  %639 = vmatprep.mubr.msk.f32.mxu1 %vm709_vm1, %v706_v2 }
  0x9f   :  { %635 = vmatprep.subr.mxu1 %v706_v2 }
  0xa0   :  { %636 = vmatpush3.msra.mxu1 %v739_v7  ;;  %595 = vmatmul.mubr.f32.vlgmr.msra.gmra.mxu0 %v143_v36 }
  0xa1   :  { %607 = vmatpush3.msra.mxu0 %v749_v12  ;;  %637 = vmatprep.subr.mxu1 %v706_v2 }
  0xa2   :  { %608 = vmatprep.subr.mxu0 %v706_v2  ;;  %638 = vmatpush3.msra.mxu1 %v743_v10 }
  0xa3   :  { %609 = vmatpush3.msra.mxu0 %v746_v11  ;;  %640 = vmatmul.mubr.msk.f32.vlgmr.msra.gmra.mxu1 %vm63_vm8, %v559_v31 }
  0xa4   :  { %610 = vmatprep.subr.mxu0 %v706_v2  ;;  %612 = vmatprep.mubr.msk.f32.mxu0 %vm709_vm1, %v706_v2 }
  0xa5   :  { %611 = vmatpush3.msra.mxu0 %v752_v13 }
  0xa6   :  { %613 = vmatmul.mubr.f32.vlgmr.msra.gmra.mxu0 %v140_v33  ;;  %624 = vmatprep.subr.mxu0 %v706_v2 }
  0xa7   :  { %625 = vmatpush3.msra.mxu0 %v178_v17  ;;  %630 = vmatprep.mubr.msk.f32.mxu0 %vm709_vm1, %v706_v2 }
  0xa8   :  { %626 = vmatprep.subr.mxu0 %v706_v2 }
  0xa9   :  { %627 = vmatpush3.msra.mxu0 %v185_v16 }
  0xaa   :  { %628 = vmatprep.subr.mxu0 %v706_v2 }
  0xab   :  { %629 = vmatpush3.msra.mxu0 %v192_v18 }
  0xac   :  { %631 = vmatmul.mubr.msk.f32.vlgmr.msra.gmra.mxu0 %vm63_vm8, %v559_v31 }
 0x157   :  { %v231_v37 = vpop.f32.mrf.mxu1 }
 0x159   :  { %v605_v38 = vpop.f32.mrf.mxu1 }
 0x15d   :  { %v385_v39 = vpop.f32.mrf.mxu1 }
 0x15f   :  { %v623_v41 = vpop.f32.mrf.mxu1 }
 0x160   :  { %v145_v42 = vpop.f32.mrf.mxu0 }
 0x161   :  { %v146_v43 = vadd.f32 %v560_v40, %v145_v42 }
 0x162   :  { %v596_v44 = vpop.f32.mrf.mxu0 }
 0x163   :  { %v539_v45 = vpop.f32.mrf.mxu1  ;;  %v232_v46 = vadd.f32 %v231_v37, %v146_v43 }
 0x165   :  { %v641_v47 = vpop.f32.mrf.mxu1 }
 0x166   :  { %v309_v48 = vpop.f32.mrf.mxu0 }
 0x167   :  { %v310_v49 = vadd.f32 %v309_v48, %v232_v46 }
 0x168   :  { %v614_v50 = vpop.f32.mrf.mxu0 }
 0x169   :  { %v386_v51 = vadd.f32 %v385_v39, %v310_v49 }
 0x16c   :  { %v465_v52 = vpop.f32.mrf.mxu0 }
 0x16d   :  { %v466_v53 = vadd.f32 %v465_v52, %v386_v51 }
 0x16e   :  { %v632_v54 = vpop.f32.mrf.mxu0 }
 0x16f   :  { %v540_v55 = vadd.f32 %v539_v45, %v466_v53 }
 0x171   :  { %543 = vst [vmem:[#allocation5] sm:$0xff] %v540_v55 }
 0x172   :  { %688 = shalt.err (!%p685_p9)
}
 0x173   :  { %553 = dma.vmem_to_hbm [thread:$0]  %s551_s22, 128, %s826_s3, [#allocation4]  }
 0x174   :  { %699 = dma.done.wait [#allocation4], 128  }
 0x175   :  { %700 = vsyncadd [#allocation4], 4294967168 }
 0x176   :  { %557 = vsyncpa [#allocation3], 1 }
 0x177   :  { %558 = vsyncpa [#allocation4], 1 }

</bundles_post_ra>
